<compile_context>
chip_gen: v7x
topology: tpu7x:2x2x1
jax: 0.10.0
libtpu: 0.0.40
codegen_flags: <defaults>
</compile_context>

<pallas_src>
from functools import lru_cache

import numpy as np
import jax
import jax.numpy as jnp
from jax.experimental import pallas as pl
from jax.experimental.pallas import tpu as pltpu

TIME_KEY = "TIME"
TARGET_KEY = "TARGET"

_LANE = 128
_SUB = 8
_NQ = 2                      # queries per sample: (start_time, end_time)
_PAD_TIME = np.float32(1e30) # padding sentinel, larger than any real retention time
_VMEM_BUDGET = 12 << 20      # per-step working-set target (conservative for v7x 64 MiB VMEM)


def inside_time_window(time_points, time):
    return time_points[0] - 1 < time and time < time_points[-1] + 1


def _next_pow2(n: int) -> int:
    n = max(1, int(n))
    return 1 << (n - 1).bit_length()


def _pow2_floor(n: int) -> int:
    n = max(1, int(n))
    return 1 << (n.bit_length() - 1)


# --------------------------------------------------------------------------- kernel

def _interp_kernel(lo_ref, inv_ref, q_ref, out_ref):
    # lo_ref:  VMEM (Bc, NPAD) f32 -- segment left endpoints tp[i]      (pad 1e30)
    # inv_ref: VMEM (Bc, NPAD) f32 -- precomputed 1/(tp[i+1]-tp[i])     (pad / zero-len = 0)
    # q_ref:   VMEM (Bc, NQ)   f32 -- query times per sample
    # out_ref: VMEM (Bc, NQ)   f32 -- fractional indices per query
    #
    # np.interp(q, tp, arange(n)) == sum_i clip((q - tp[i]) / (tp[i+1]-tp[i]), 0, 1)
    # Padded segments contribute exactly 0 (lo = 1e30, inv = 0 -> product 0), so the
    # formulation is NaN-free and needs no roll / searchsorted / gather.
    lo = lo_ref[...]                                     # (Bc, NPAD)
    inv = inv_ref[...]                                   # (Bc, NPAD)
    for j in range(_NQ):                                 # static unroll (2 queries)
        qj = q_ref[:, j:j + 1]                           # (Bc, 1)
        contrib = jnp.clip((qj - lo) * inv, 0.0, 1.0)    # (Bc, NPAD)  VPU only
        out_ref[:, j:j + 1] = jnp.sum(contrib, axis=-1, keepdims=True)  # XLU lane-reduce


@lru_cache(maxsize=None)
def _build_interp_call(bpad: int, npad: int, bc: int):
    num_chunks = bpad // bc
    sem = ("parallel",) if num_chunks >= 2 else ("arbitrary",)
    call = pl.pallas_call(
        _interp_kernel,
        out_shape=jax.ShapeDtypeStruct((bpad, _NQ), jnp.float32),
        grid=(num_chunks,),
        in_specs=[
            pl.BlockSpec((bc, npad), lambda b: (b, 0)),
            pl.BlockSpec((bc, npad), lambda b: (b, 0)),
            pl.BlockSpec((bc, _NQ), lambda b: (b, 0)),
        ],
        out_specs=pl.BlockSpec((bc, _NQ), lambda b: (b, 0)),
        compiler_params=pltpu.CompilerParams(
            dimension_semantics=sem,
            vmem_limit_bytes=32 * 1024 * 1024,   # fits v7x scoped default; plenty of headroom
        ),
    )
    return jax.jit(call)


def batched_interp_index(time_points_list, queries):
    """np.interp(queries[b], time_points_list[b], arange(len)) for a batch, one kernel launch.

    time_points_list: list of B 1-D float arrays (strictly increasing retention times)
    queries:          (B, 2) float array of query times
    returns:          (B, 2) float32 fractional indices
    """
    queries = np.asarray(queries, np.float64)
    B, nq = queries.shape
    assert nq == _NQ

    n_max = max(int(np.asarray(tp).shape[0]) for tp in time_points_list)
    # Bucket NPAD to power-of-two multiples of 128 to keep the compile cache hot.
    npad = _LANE * _next_pow2(int(pl.cdiv(max(n_max, 2), _LANE)))
    # Bucket padded batch to 8 * next_pow2 (sublane-aligned, few distinct cache keys).
    bpad = _SUB * _next_pow2(int(pl.cdiv(max(B, 1), _SUB)))
    # Chunk size: biggest power of two so lo/inv (double-buffered) + the (Bc, NPAD)
    # intermediate stay under ~12 MiB per step (safe on v7x; trivially safe on v5e/v6e).
    per_sample_bytes = 5 * npad * 4
    bc = min(bpad, max(_SUB, _pow2_floor(min(4096, _VMEM_BUDGET // per_sample_bytes))))

    # ---------- host-side (numpy) packing: sublane-dense (Bpad, NPAD) slabs ----------
    lo = np.full((bpad, npad), _PAD_TIME, np.float32)
    inv = np.zeros((bpad, npad), np.float32)
    for b, tp in enumerate(time_points_list):
        tp = np.asarray(tp, np.float64)
        n = tp.shape[0]
        if n >= 2:
            d = np.diff(tp)
            lo[b, : n - 1] = tp[: n - 1].astype(np.float32)
            # zero-length (duplicated) segments get inv=0 -> contribute 0 (axes are
            # strictly increasing in practice; np.interp is undefined there anyway).
            inv[b, : n - 1] = np.divide(
                1.0, d, out=np.zeros_like(d), where=d > 0
            ).astype(np.float32)

    qpad = np.zeros((bpad, _NQ), np.float32)
    qpad[:B] = queries.astype(np.float32)

    out = _build_interp_call(bpad, npad, bc)(
        jnp.asarray(lo), jnp.asarray(inv), jnp.asarray(qpad)
    )
    out = np.asarray(jax.block_until_ready(out))
    return out[:B]


# --------------------------------------------------------------------------- transform

class MakeTargets:
    """JAX/Pallas port of deepmrm MakeTagets.

    Accepts a single sample dict or a list of sample dicts; a list is processed
    with ONE batched pallas_call. The dict plumbing / manual_boundary branching /
    warning logging stay on the host, exactly mirroring the original numpy semantics.
    """

    def __call__(self, samples):
        single = isinstance(samples, dict)
        batch = [samples] if single else list(samples)

        tp_list = [np.asarray(s[TIME_KEY], dtype=np.float32) for s in batch]
        queries = np.array(
            [[float(s["start_time"]), float(s["end_time"])] for s in batch],
            dtype=np.float64,
        )

        for tp, (st, et) in zip(tp_list, queries):
            if not inside_time_window(tp, st) or not inside_time_window(tp, et):
                print(f"WARNING: {st}-{et} is outside of range {tp[0]}-{tp[-1]}")

        boundary_idx = batched_interp_index(tp_list, queries)  # (B, 2) float32

        for s, bidx in zip(batch, boundary_idx):
            if s["manual_boundary"] > 0:
                s[TARGET_KEY] = {
                    "boxes": bidx.reshape(1, -1).astype(np.float32),
                    "labels": np.array([1], dtype=np.int64),
                }
            else:
                s[TARGET_KEY] = {
                    "boxes": np.zeros((0, 2), dtype=np.float32),
                    "labels": np.zeros(0, dtype=np.int64),
                }
        return batch[0] if single else batch


# --------------------------------------------------------------------------- demo / test

if __name__ == "__main__":
    key = jax.random.PRNGKey(0)
    B = 2
    n_points = 16

    # strictly increasing retention-time axes, one per sample
    deltas = jax.random.uniform(key, (B, n_points), minval=0.2, maxval=1.0)
    tps = np.asarray(jnp.cumsum(deltas, axis=1) + 5.0, dtype=np.float32)

    samples = []
    # sample 0: exact grid-point hit + interior fractional boundary
    tp0 = tps[0]
    samples.append({
        TIME_KEY: tp0,
        "start_time": float(tp0[3]),                                   # q == tp[k]
        "end_time": float(tp0[10] + 0.7 * (tp0[11] - tp0[10])),        # interior fraction
        "manual_boundary": 1,
    })
    # sample 1: queries just outside the time range (clamped by np.interp, no warning)
    tp1 = tps[1]
    samples.append({
        TIME_KEY: tp1,
        "start_time": float(tp1[0] - 0.5),                             # clamps to 0
        "end_time": float(tp1[-1] + 0.5),                              # clamps to n-1
        "manual_boundary": 1,
    })

    # direct batched-kernel call (single pallas_call, single grid step for this size)
    q_all = np.array([[s["start_time"], s["end_time"]] for s in samples], np.float64)
    idx_all = batched_interp_index([s[TIME_KEY] for s in samples], q_all)
    idx_all = np.asarray(idx_all)

    # transform path (same kernel, dict plumbing on host)
    out_samples = MakeTargets()(samples)

    for b, s in enumerate(out_samples):
        tp = np.asarray(s[TIME_KEY], np.float64)
        ref = np.interp(np.array([s["start_time"], s["end_time"]], np.float64),
                        tp, np.arange(len(tp))).astype(np.float32)
        got = s[TARGET_KEY]["boxes"].reshape(-1)
        assert np.allclose(got, ref, atol=1e-4, rtol=1e-5), (b, got, ref)
        assert np.allclose(idx_all[b], ref, atol=1e-4, rtol=1e-5), (b, idx_all[b], ref)
        assert s[TARGET_KEY]["labels"].dtype == np.int64
        assert s[TARGET_KEY]["boxes"].shape == (1, 2)

    # single-sample path + manual_boundary == 0 branch
    s2 = dict(out_samples[0], manual_boundary=0)
    s2 = MakeTargets()(s2)
    assert s2[TARGET_KEY]["boxes"].shape == (0, 2)
    assert s2[TARGET_KEY]["labels"].shape == (0,)

    print("KERNEL_OK")
</pallas_src>

<mosaic_0001>
module attributes {stable_mosaic.version = 11 : i64} {
  func.func @_interp_kernel(%arg0: i32, %arg1: memref<8x128xf32, #tpu.memory_space<vmem>>, %arg2: memref<8x128xf32, #tpu.memory_space<vmem>>, %arg3: memref<8x2xf32, #tpu.memory_space<vmem>>, %arg4: memref<8x2xf32, #tpu.memory_space<vmem>>) attributes {dimension_semantics = [#tpu.dimension_semantics<arbitrary>], iteration_bounds = array<i64: 1>, scalar_prefetch = 0 : i64, scratch_operands = 0 : i64, tpu.core_type = #tpu.core_type<tc>, window_params = [{transform_indices = @transform_0, window_bounds = array<i64: 8, 128>}, {transform_indices = @transform_1, window_bounds = array<i64: 8, 128>}, {transform_indices = @transform_2, window_bounds = array<i64: 8, 2>}, {transform_indices = @transform_3, window_bounds = array<i64: 8, 2>}]} {
    %c0 = arith.constant 0 : index
    %c0_0 = arith.constant 0 : index
    %0 = vector.load %arg1[%c0, %c0_0] : memref<8x128xf32, #tpu.memory_space<vmem>>, vector<8x128xf32>
    %c0_1 = arith.constant 0 : index
    %c0_2 = arith.constant 0 : index
    %1 = vector.load %arg2[%c0_1, %c0_2] : memref<8x128xf32, #tpu.memory_space<vmem>>, vector<8x128xf32>
    %c0_3 = arith.constant 0 : index
    %c0_4 = arith.constant 0 : index
    %2 = vector.load %arg3[%c0_3, %c0_4] : memref<8x2xf32, #tpu.memory_space<vmem>>, vector<8x1xf32>
    %3 = vector.broadcast %2 : vector<8x1xf32> to vector<8x128xf32>
    %4 = arith.subf %3, %0 : vector<8x128xf32>
    %5 = arith.mulf %4, %1 : vector<8x128xf32>
    %cst = arith.constant 0.000000e+00 : f32
    %cst_5 = arith.constant 1.000000e+00 : f32
    %6 = vector.broadcast %cst : f32 to vector<8x128xf32>
    %7 = arith.maximumf %6, %5 : vector<8x128xf32>
    %8 = vector.broadcast %cst_5 : f32 to vector<8x128xf32>
    %9 = arith.minimumf %8, %7 : vector<8x128xf32>
    %cst_6 = arith.constant dense<0.000000e+00> : vector<8xf32>
    %10 = vector.multi_reduction <add>, %9, %cst_6 [1] : vector<8x128xf32> to vector<8xf32>
    %11 = vector.shape_cast %10 : vector<8xf32> to vector<8x1xf32>
    %c0_7 = arith.constant 0 : index
    %c0_8 = arith.constant 0 : index
    %12 = vector.load %arg4[%c0_7, %c0_8] : memref<8x2xf32, #tpu.memory_space<vmem>>, vector<8x1xf32>
    tpu.vector_store %arg4[%c0_7, %c0_8], %11 {strides = array<i32>} : memref<8x2xf32, #tpu.memory_space<vmem>>, vector<8x1xf32>,
    %c0_9 = arith.constant 0 : index
    %c1 = arith.constant 1 : index
    %13 = vector.load %arg3[%c0_9, %c1] : memref<8x2xf32, #tpu.memory_space<vmem>>, vector<8x1xf32>
    %14 = vector.broadcast %13 : vector<8x1xf32> to vector<8x128xf32>
    %15 = arith.subf %14, %0 : vector<8x128xf32>
    %16 = arith.mulf %15, %1 : vector<8x128xf32>
    %cst_10 = arith.constant 0.000000e+00 : f32
    %cst_11 = arith.constant 1.000000e+00 : f32
    %17 = vector.broadcast %cst_10 : f32 to vector<8x128xf32>
    %18 = arith.maximumf %17, %16 : vector<8x128xf32>
    %19 = vector.broadcast %cst_11 : f32 to vector<8x128xf32>
    %20 = arith.minimumf %19, %18 : vector<8x128xf32>
    %cst_12 = arith.constant dense<0.000000e+00> : vector<8xf32>
    %21 = vector.multi_reduction <add>, %20, %cst_12 [1] : vector<8x128xf32> to vector<8xf32>
    %22 = vector.shape_cast %21 : vector<8xf32> to vector<8x1xf32>
    %c0_13 = arith.constant 0 : index
    %c1_14 = arith.constant 1 : index
    %23 = vector.load %arg4[%c0_13, %c1_14] : memref<8x2xf32, #tpu.memory_space<vmem>>, vector<8x1xf32>
    tpu.vector_store %arg4[%c0_13, %c1_14], %22 {strides = array<i32>} : memref<8x2xf32, #tpu.memory_space<vmem>>, vector<8x1xf32>,
    return
  }
  func.func @transform_0(%arg0: i32) -> (i32, i32) {
    %c0_i32 = arith.constant 0 : i32
    %c0_i32_0 = arith.constant 0 : i32
    return %arg0, %c0_i32 : i32, i32
  }
  func.func @transform_1(%arg0: i32) -> (i32, i32) {
    %c0_i32 = arith.constant 0 : i32
    %c0_i32_0 = arith.constant 0 : i32
    return %arg0, %c0_i32 : i32, i32
  }
  func.func @transform_2(%arg0: i32) -> (i32, i32) {
    %c0_i32 = arith.constant 0 : i32
    %c0_i32_0 = arith.constant 0 : i32
    return %arg0, %c0_i32 : i32, i32
  }
  func.func @transform_3(%arg0: i32) -> (i32, i32) {
    %c0_i32 = arith.constant 0 : i32
    %c0_i32_0 = arith.constant 0 : i32
    return %arg0, %c0_i32 : i32, i32
  }
}

</mosaic_0001>

<bundles_post_ra>
// kernel: tpu_custom_call.1
= control target key start
LH: loop header
LB: loop body
LE: loop exit
PB: predicated region body
PF: predicated region fallthrough
CT: control target
= control target key end

     0   :  { %8 = vsyncpa [#allocation3], 0  ;;  %s90_s12 = smov [#allocation2]   ;;  %s137_s0 = inlined_call_operand.vmem [shape: f32[8,128], index: 0, kind: input, shape index: {}]   ;;  %s138_s1 = inlined_call_operand.hbm [shape: f32[8,128], index: 1, kind: input, shape index: {}]   ;;  %s139_s2 = inlined_call_operand.vmem [shape: f32[8,2], index: 2, kind: input, shape index: {}]   ;;  %s140_s3 = inlined_call_operand.vmem [shape: f32[8,2], index: 3, kind: output, shape index: {}]  }
   0x1   :  { %s17_s13 = sshll.u32 %s90_s12, 4  ;;  %s66_s16 = scalar_lea.hbm %s138_s1, 128  ;;  %s18_s13 = int_to_ptr.vmem [resolvable:$true] %s17_s13 }
   0x2   :  { %p67_p0 = scmp.ne.s32.totalorder %s138_s1, %s66_s16  ;;  %p70_p1 = scmp.lt.u32.totalorder %s66_s16, %s138_s1 }
   0x4   :  { %p72_p2 = pnand %p70_p1, %p67_p0 }
   0x6   :  { %75 = shalt.err (!%p72_p2)
}
   0x7   :  { %s76_s21 = scalar_lea.vmem %s18_s13, 128  ;;  %p81_p4 = scmp.lt.s32.totalorder %s18_s13, %s18_s13 }
   0x8   :  { %p77_p3 = scmp.ne.s32.totalorder %s18_s13, %s76_s21  ;;  %p82_p5 = scmp.lt.s32.totalorder %s76_s21, %s76_s21 }
   0xa   :  { %p83_p6 = por %p82_p5, %p81_p4 }
   0xc   :  { %p84_p7 = pnand %p83_p6, %p77_p3 }
   0xe   :  { %87 = shalt.err (!%p84_p7)
}
   0xf   :  { %20 = dma.hbm_to_vmem [thread:$0]  %s138_s1, 128, %s18_s13, [#allocation3]  }
  0x10   :  { %88 = dma.done.wait [#allocation3], 128  }
  0x11   :  { %89 = vsyncadd [#allocation3], 4294967168  ;;  %v91_v0 = vmov 0   ;;  %v28_v1 = vld [vmem:[%s139_s2] sm:$0xff]  ;;  %v92_v2 = vmov 1   ;;  %vm40_vm0 = vcmask 7168  }
  0x12   :  { %64 = vset.pattern.permute.xlu0 %v91_v0  ;;  %v26_v3 = vld [vmem:[%s137_s0] sm:$0xff]  ;;  %vm54_vm1 = vcmask 15368  }
  0x13   :  { %31 = vperm.xlu0 %64, %v28_v1   ;;  %v27_v5 = vld [vmem:[#allocation2] sm:$0xff] }
  0x17   :  { %65 = vset.pattern.permute.xlu0 %v92_v2 }
  0x18   :  { %45 = vperm.xlu0 %65, %v28_v1  }
  0x92   :  { %v32_v4 = vpop.permute.xlu0 %31 }
  0x93   :  { %v34_v6 = vsub.f32 %v32_v4, %v26_v3 }
  0x95   :  { %v35_v7 = vmul.f32 %v34_v6, %v27_v5 }
  0x97   :  { %v46_v8 = vpop.permute.xlu0 %45  ;;  %v36_v9 = vmax.f32 %v35_v7, 0.0 }
  0x98   :  { %v48_v10 = vsub.f32 %v46_v8, %v26_v3 }
  0x99   :  { %v37_v11 = vmin.f32 %v36_v9, 1.0 }
  0x9a   :  { %v49_v12 = vmul.f32 %v48_v10, %v27_v5 }
  0x9b   :  { %38 = vadd.xlane.f32.xlu1 %v37_v11 }
  0x9c   :  { %v50_v13 = vmax.f32 %v49_v12, 0.0 }
  0x9e   :  { %v51_v14 = vmin.f32 %v50_v13, 1.0 }
  0xa0   :  { %52 = vadd.xlane.f32.xlu1 %v51_v14 }
 0x128   :  { %v39_v15 = vpop.xlane.xlu1 %38 }
 0x129   :  { %41 = vst.msk [vmem:[%s140_s3] sm:$0xff] %vm40_vm0, %v39_v15 }
 0x12d   :  { %v53_v16 = vpop.xlane.xlu1 %52 }
 0x12e   :  { %55 = vst.msk [vmem:[%s140_s3] sm:$0xff] %vm54_vm1, %v53_v16 }
 0x12f   :  { %60 = vsyncpa [#allocation3], 1 }

</bundles_post_ra>
